<compile_context>
chip_gen: v6e
topology: v6e:2x2x1
jax: 0.10.0
libtpu: 0.0.40
codegen_flags: <defaults>
</compile_context>

<pallas_src>
import numpy as np
import jax
import jax.numpy as jnp
from jax.experimental import pallas as pl
from jax.experimental.pallas import tpu as pltpu


def svdpp_kernel(ue_ref, iv_ref, ie_ref,    # (D, TB) slabs: latent on sublanes, batch on lanes
                 ub_ref, ib_ref,            # (1, TB) lane-dense bias rows
                 gb_ref,                    # (1,) global bias scalar in SMEM
                 out_ref):                  # (1, TB) lane-dense output block
    # enhanced_user_embed = p_u + implicit(u); dot over latent (sublane) axis.
    dot = jnp.sum((ue_ref[...] + iv_ref[...]) * ie_ref[...],
                  axis=0, keepdims=True)                     # (1, TB)
    out_ref[...] = gb_ref[0] + ub_ref[...] + ib_ref[...] + dot


def svdpp_forward(user_ids, item_ids, user_emb, implicit_table, item_emb,
                  user_bias, item_bias, global_bias, *, tile_b=256):
    """Batched SVD++ predictions. Returns shape (B,) float32."""
    B = user_ids.shape[0]
    D = user_emb.shape[1]

    num_tiles = -(-B // tile_b)            # cdiv
    b_pad = num_tiles * tile_b
    pad = b_pad - B

    # Pad ids with 0 (a valid row); padded predictions are discarded at the end.
    uid = jnp.pad(user_ids, (0, pad))
    iid = jnp.pad(item_ids, (0, pad))

    # Wrapper-side gathers -> dense contiguous slabs for the kernel.
    # Transposed to (D, B_pad): batch on the lane (last) axis.
    ue = jnp.take(user_emb, uid, axis=0).T               # (D, B_pad)
    iv = jnp.take(implicit_table, uid, axis=0).T         # (D, B_pad)
    ie = jnp.take(item_emb, iid, axis=0).T               # (D, B_pad)
    ub = jnp.take(user_bias[:, 0], uid, axis=0).reshape(num_tiles, tile_b)
    ib = jnp.take(item_bias[:, 0], iid, axis=0).reshape(num_tiles, tile_b)

    grid_spec = pltpu.PrefetchScalarGridSpec(
        num_scalar_prefetch=0,
        grid=(num_tiles,),
        in_specs=[
            pl.BlockSpec((D, tile_b), lambda t: (0, t)),           # p_u slab
            pl.BlockSpec((D, tile_b), lambda t: (0, t)),           # implicit(u) slab
            pl.BlockSpec((D, tile_b), lambda t: (0, t)),           # q_i slab
            pl.BlockSpec((1, tile_b), lambda t: (t, 0)),           # user bias row
            pl.BlockSpec((1, tile_b), lambda t: (t, 0)),           # item bias row
            pl.BlockSpec(memory_space=pltpu.MemorySpace.SMEM),     # global bias scalar
        ],
        out_specs=pl.BlockSpec((1, tile_b), lambda t: (t, 0)),
    )

    out = pl.pallas_call(
        svdpp_kernel,
        grid_spec=grid_spec,
        out_shape=jax.ShapeDtypeStruct((num_tiles, tile_b), jnp.float32),
        compiler_params=pltpu.CompilerParams(
            dimension_semantics=("parallel",)),     # shard batch tiles across TCs on v7x
    )(ue, iv, ie, ub, ib, global_bias)

    return out.reshape(b_pad)[:B]


def precompute_implicit_table(interaction_matrix, implicit_fb):
    """Plain-JAX equivalent of precompute_user_implicit_vectors (not the hot
    forward path): |N(u)|^(-1/2) * sum_{j in N(u)} y_j, per user."""
    counts = interaction_matrix.sum(axis=1)                       # (U,)
    norm = jnp.where(counts > 0, 1.0 / jnp.sqrt(jnp.maximum(counts, 1.0)), 0.0)
    sums = interaction_matrix @ implicit_fb                       # (U, D)
    return norm[:, None] * sums                                   # (U, D)


if __name__ == "__main__":
    num_users = 64
    num_items = 128
    latent_factors = 32
    batch = 8
    init_std = 0.1

    key = jax.random.PRNGKey(0)
    k_ue, k_ie, k_if, k_int, k_u, k_i = jax.random.split(key, 6)

    # Deterministic parameter init (mirrors _init_weights)
    user_emb = init_std * jax.random.normal(k_ue, (num_users, latent_factors), jnp.float32)
    item_emb = init_std * jax.random.normal(k_ie, (num_items, latent_factors), jnp.float32)
    implicit_fb = init_std * jax.random.normal(k_if, (num_items, latent_factors), jnp.float32)
    user_bias = jnp.zeros((num_users, 1), jnp.float32)
    item_bias = jnp.zeros((num_items, 1), jnp.float32)
    global_bias = jnp.zeros((1,), jnp.float32)

    # Synthetic user->items implicit-feedback sets (as a 0/1 matrix) and the
    # precomputed per-user implicit vectors (the forward pass reads this cache).
    # TODO(synk): the original precompute walks Python dicts of raw ids; here it is
    # expressed as a dense interaction-matrix precompute outside the kernel.
    interactions = jax.random.bernoulli(k_int, 0.2, (num_users, num_items)).astype(jnp.float32)
    implicit_table = precompute_implicit_table(interactions, implicit_fb)

    # Batch of (user, item) ids
    user_ids = jax.random.randint(k_u, (batch,), 0, num_users, jnp.int32)
    item_ids = jax.random.randint(k_i, (batch,), 0, num_items, jnp.int32)

    preds = svdpp_forward(user_ids, item_ids, user_emb, implicit_table, item_emb,
                          user_bias, item_bias, global_bias)
    preds = jax.block_until_ready(preds)

    # Pure-JAX reference of the PyTorch forward
    ue = user_emb[user_ids]
    iv = implicit_table[user_ids]
    ie = item_emb[item_ids]
    ub = user_bias[user_ids, 0]
    ib = item_bias[item_ids, 0]
    ref = global_bias[0] + ub + ib + jnp.sum((ue + iv) * ie, axis=1)

    np.testing.assert_allclose(np.asarray(preds), np.asarray(ref), rtol=1e-5, atol=1e-5)
    print("KERNEL_OK")
</pallas_src>

<mosaic_0001>
module attributes {stable_mosaic.version = 11 : i64} {
  func.func @svdpp_kernel(%arg0: i32, %arg1: memref<32x256xf32, #tpu.memory_space<vmem>>, %arg2: memref<32x256xf32, #tpu.memory_space<vmem>>, %arg3: memref<32x256xf32, #tpu.memory_space<vmem>>, %arg4: memref<1x256xf32, #tpu.memory_space<vmem>>, %arg5: memref<1x256xf32, #tpu.memory_space<vmem>>, %arg6: memref<1xf32, #tpu.memory_space<smem>>, %arg7: memref<1x256xf32, #tpu.memory_space<vmem>>) attributes {dimension_semantics = [#tpu.dimension_semantics<parallel>], iteration_bounds = array<i64: 1>, scalar_prefetch = 0 : i64, scratch_operands = 0 : i64, tpu.core_type = #tpu.core_type<tc>, window_params = [{transform_indices = @transform_0, window_bounds = array<i64: 32, 256>}, {transform_indices = @transform_1, window_bounds = array<i64: 32, 256>}, {transform_indices = @transform_2, window_bounds = array<i64: 32, 256>}, {transform_indices = @transform_3, window_bounds = array<i64: 1, 256>}, {transform_indices = @transform_4, window_bounds = array<i64: 1, 256>}, {transform_indices = @transform_5, window_bounds = array<i64: 1>}, {transform_indices = @transform_6, window_bounds = array<i64: 1, 256>}]} {
    %c0 = arith.constant 0 : index
    %c0_0 = arith.constant 0 : index
    %0 = vector.load %arg1[%c0, %c0_0] : memref<32x256xf32, #tpu.memory_space<vmem>>, vector<32x256xf32>
    %c0_1 = arith.constant 0 : index
    %c0_2 = arith.constant 0 : index
    %1 = vector.load %arg2[%c0_1, %c0_2] : memref<32x256xf32, #tpu.memory_space<vmem>>, vector<32x256xf32>
    %2 = arith.addf %0, %1 : vector<32x256xf32>
    %c0_3 = arith.constant 0 : index
    %c0_4 = arith.constant 0 : index
    %3 = vector.load %arg3[%c0_3, %c0_4] : memref<32x256xf32, #tpu.memory_space<vmem>>, vector<32x256xf32>
    %4 = arith.mulf %2, %3 : vector<32x256xf32>
    %cst = arith.constant dense<0.000000e+00> : vector<256xf32>
    %5 = vector.multi_reduction <add>, %4, %cst [0] : vector<32x256xf32> to vector<256xf32>
    %6 = vector.shape_cast %5 : vector<256xf32> to vector<1x256xf32>
    %c0_5 = arith.constant 0 : index
    %7 = memref.load %arg6[%c0_5] : memref<1xf32, #tpu.memory_space<smem>>
    %c0_6 = arith.constant 0 : index
    %c0_7 = arith.constant 0 : index
    %8 = vector.load %arg4[%c0_6, %c0_7] : memref<1x256xf32, #tpu.memory_space<vmem>>, vector<1x256xf32>
    %9 = vector.broadcast %7 : f32 to vector<1x256xf32>
    %10 = arith.addf %9, %8 : vector<1x256xf32>
    %c0_8 = arith.constant 0 : index
    %c0_9 = arith.constant 0 : index
    %11 = vector.load %arg5[%c0_8, %c0_9] : memref<1x256xf32, #tpu.memory_space<vmem>>, vector<1x256xf32>
    %12 = arith.addf %10, %11 : vector<1x256xf32>
    %13 = arith.addf %12, %6 : vector<1x256xf32>
    %c0_10 = arith.constant 0 : index
    %c0_11 = arith.constant 0 : index
    %14 = vector.load %arg7[%c0_10, %c0_11] : memref<1x256xf32, #tpu.memory_space<vmem>>, vector<1x256xf32>
    tpu.vector_store %arg7[%c0_10, %c0_11], %13 {strides = array<i32>} : memref<1x256xf32, #tpu.memory_space<vmem>>, vector<1x256xf32>,
    return
  }
  func.func @transform_0(%arg0: i32) -> (i32, i32) {
    %c0_i32 = arith.constant 0 : i32
    %c0_i32_0 = arith.constant 0 : i32
    return %c0_i32, %arg0 : i32, i32
  }
  func.func @transform_1(%arg0: i32) -> (i32, i32) {
    %c0_i32 = arith.constant 0 : i32
    %c0_i32_0 = arith.constant 0 : i32
    return %c0_i32, %arg0 : i32, i32
  }
  func.func @transform_2(%arg0: i32) -> (i32, i32) {
    %c0_i32 = arith.constant 0 : i32
    %c0_i32_0 = arith.constant 0 : i32
    return %c0_i32, %arg0 : i32, i32
  }
  func.func @transform_3(%arg0: i32) -> (i32, i32) {
    %c0_i32 = arith.constant 0 : i32
    %c0_i32_0 = arith.constant 0 : i32
    return %arg0, %c0_i32 : i32, i32
  }
  func.func @transform_4(%arg0: i32) -> (i32, i32) {
    %c0_i32 = arith.constant 0 : i32
    %c0_i32_0 = arith.constant 0 : i32
    return %arg0, %c0_i32 : i32, i32
  }
  func.func @transform_5(%arg0: i32) -> i32 {
    %c0_i32 = arith.constant 0 : i32
    %c0_i32_0 = arith.constant 0 : i32
    return %c0_i32 : i32
  }
  func.func @transform_6(%arg0: i32) -> (i32, i32) {
    %c0_i32 = arith.constant 0 : i32
    %c0_i32_0 = arith.constant 0 : i32
    return %arg0, %c0_i32 : i32, i32
  }
}

</mosaic_0001>

<bundles_post_ra>
// kernel: tpu_custom_call.1
= control target key start
LH: loop header
LB: loop body
LE: loop exit
PB: predicated region body
PF: predicated region fallthrough
CT: control target
= control target key end

     0   :  { %12 = vsyncpa [#allocation4], 0  ;;  %s326_s0 = inlined_call_operand.hbm [shape: f32[32,256], index: 0, kind: input, shape index: {}]   ;;  %s327_s1 = inlined_call_operand.hbm [shape: f32[32,256], index: 1, kind: input, shape index: {}]   ;;  %s328_s2 = inlined_call_operand.hbm [shape: f32[32,256], index: 2, kind: input, shape index: {}]   ;;  %s329_s3 = inlined_call_operand.vmem [shape: f32[1,256], index: 3, kind: input, shape index: {}]   ;;  %s330_s4 = inlined_call_operand.vmem [shape: f32[1,256], index: 4, kind: input, shape index: {}]   ;;  %s331_s5 = inlined_call_operand.<no memory space> [shape: f32[1], index: 5, kind: input, shape index: {}]   ;;  %s332_s6 = inlined_call_operand.hbm [shape: f32[1,256], index: 6, kind: output, shape index: {}]  }
   0x1   :  { %13 = vsyncpa [#allocation7], 0 }
   0x2   :  { %14 = vsyncpa [#allocation5], 0  ;;  %s263_s21 = smov [#allocation6]   ;;  %s264_s23 = smov [#allocation3]  }
   0x3   :  { %s32_s22 = sshll.u32 %s263_s21, 4  ;;  %s20_s24 = sshll.u32 %s264_s23, 4  ;;  %s33_s22 = int_to_ptr.vmem [resolvable:$true] %s32_s22  ;;  %s21_s24 = int_to_ptr.vmem [resolvable:$true] %s20_s24 }
   0x4   :  { %s185_s25 = scalar_lea.vmem %s33_s22, 1024  ;;  %p190_p1 = scmp.lt.s32.totalorder %s33_s22, %s33_s22 }
   0x5   :  { %p186_p0 = scmp.ne.s32.totalorder %s33_s22, %s185_s25  ;;  %p191_p2 = scmp.lt.s32.totalorder %s185_s25, %s185_s25 }
   0x7   :  { %p192_p3 = por %p191_p2, %p190_p1 }
   0x9   :  { %p193_p4 = pnand %p192_p3, %p186_p0 }
   0xb   :  { %196 = shalt.err (!%p193_p4)
}
   0xc   :  { %s265_s26 = smov 256   ;;  %s266_s27 = smov 16  }
   0xd   :  { %38 = dma.hbm_to_vmem [thread:$0]  %s327_s1, 1024, %s33_s22, [#allocation7], %s265_s26, %s265_s26, %s266_s27  }
   0xe   :  { %s205_s30 = scalar_lea.vmem %s21_s24, 1024  ;;  %p210_p6 = scmp.lt.s32.totalorder %s21_s24, %s21_s24 }
   0xf   :  { %p206_p5 = scmp.ne.s32.totalorder %s21_s24, %s205_s30  ;;  %p211_p7 = scmp.lt.s32.totalorder %s205_s30, %s205_s30 }
  0x11   :  { %p212_p8 = por %p211_p7, %p210_p6 }
  0x13   :  { %p213_p9 = pnand %p212_p8, %p206_p5 }
  0x15   :  { %216 = shalt.err (!%p213_p9)
}
  0x16   :  { %26 = dma.hbm_to_vmem [thread:$0]  %s326_s0, 1024, %s21_s24, [#allocation4], %s265_s26, %s265_s26, %s266_s27  }
  0x17   :  { %s267_s9 = smov [#allocation8]  }
  0x18   :  { %s44_s10 = sshll.u32 %s267_s9, 4  ;;  %s45_s10 = int_to_ptr.vmem [resolvable:$true] %s44_s10 }
  0x19   :  { %s225_s11 = scalar_lea.vmem %s45_s10, 1024  ;;  %p230_p11 = scmp.lt.s32.totalorder %s45_s10, %s45_s10 }
  0x1a   :  { %p226_p10 = scmp.ne.s32.totalorder %s45_s10, %s225_s11  ;;  %p231_p12 = scmp.lt.s32.totalorder %s225_s11, %s225_s11 }
  0x1c   :  { %p232_p13 = por %p231_p12, %p230_p11 }
  0x1e   :  { %p233_p0 = pnand %p232_p13, %p226_p10 }
  0x20   :  { %236 = shalt.err (!%p233_p0)
}
  0x21   :  { %50 = dma.hbm_to_vmem [thread:$0]  %s328_s2, 1024, %s45_s10, [#allocation7], %s265_s26, %s265_s26, %s266_s27  }
  0x22   :  { %257 = dma.done.wait [#allocation4], 1024  }
  0x23   :  { %258 = vsyncadd [#allocation4], 4294966272 }
  0x24   :  { %259 = dma.done.wait [#allocation7], 2048  }
  0x25   :  { %260 = vsyncadd [#allocation7], 4294965248  ;;  %v66_v0 = vld [vmem:[#allocation3] sm:$0xff]  ;;  %v67_v1 = vld [vmem:[#allocation3 + $0x8] sm:$0xff]  ;;  %v268_v50 = vmov 1966171168   ;;  %v136_v52 = vlaneseq  ;;  %v126_v60 = vstv %s331_s5 }
  0x26   :  { %v68_v2 = vld [vmem:[#allocation3 + $0x10] sm:$0xff]  ;;  %v69_v3 = vld [vmem:[#allocation3 + $0x18] sm:$0xff]  ;;  %v70_v4 = vld [vmem:[#allocation3 + $0x20] sm:$0xff]  ;;  %v134_v51 = vunpack.c.l.s4 %v268_v50  ;;  %s269_s17 = smov [#allocation9]  }
  0x27   :  { %v71_v5 = vld [vmem:[#allocation3 + $0x28] sm:$0xff]  ;;  %v72_v6 = vld [vmem:[#allocation3 + $0x30] sm:$0xff]  ;;  %v73_v7 = vld [vmem:[#allocation3 + $0x38] sm:$0xff]  ;;  %v137_v58 = vshrl.u32 %v136_v52, 7  ;;  %s160_s18 = sshll.u32 %s269_s17, 4  ;;  %vm151_vm0 = vcmp.lt.s32.totalorder %v136_v52, 256  ;;  %s161_s18 = int_to_ptr.vmem [resolvable:$true] %s160_s18 }
  0x28   :  { %v74_v8 = vld [vmem:[#allocation6] sm:$0xff]  ;;  %v75_v9 = vld [vmem:[#allocation6 + $0x8] sm:$0xff]  ;;  %v76_v10 = vld [vmem:[#allocation6 + $0x10] sm:$0xff]  ;;  %v135_v57 = vunpack.c.0.s8 %v134_v51  ;;  %p242_p2 = scmp.lt.s32.totalorder %s161_s18, %s161_s18 }
  0x29   :  { %v77_v11 = vld [vmem:[#allocation6 + $0x18] sm:$0xff]  ;;  %v82_v12 = vadd.f32 %v74_v8, %v66_v0  ;;  %v78_v13 = vld [vmem:[#allocation6 + $0x20] sm:$0xff]  ;;  %v79_v14 = vld [vmem:[#allocation6 + $0x28] sm:$0xff]  ;;  %v83_v16 = vadd.f32 %v75_v9, %v67_v1  ;;  %v84_v17 = vadd.f32 %v76_v10, %v68_v2 }
  0x2a   :  { %v80_v15 = vld [vmem:[#allocation6 + $0x30] sm:$0xff]  ;;  %v85_v18 = vadd.f32 %v77_v11, %v69_v3  ;;  %v81_v19 = vld [vmem:[#allocation6 + $0x38] sm:$0xff]  ;;  %v86_v20 = vadd.f32 %v78_v13, %v70_v4  ;;  %v87_v21 = vadd.f32 %v79_v14, %v71_v5  ;;  %v90_v23 = vld [vmem:[#allocation8] sm:$0xff]  ;;  %v138_v2 = vsub.s32 %v135_v57, %v137_v58 }
  0x2b   :  { %v88_v22 = vadd.f32 %v80_v15, %v72_v6  ;;  %v91_v24 = vld [vmem:[#allocation8 + $0x8] sm:$0xff]  ;;  %v89_v25 = vadd.f32 %v81_v19, %v73_v7  ;;  %v92_v26 = vld [vmem:[#allocation8 + $0x10] sm:$0xff]  ;;  %v93_v27 = vld [vmem:[#allocation8 + $0x18] sm:$0xff]  ;;  %v98_v29 = vmul.f32 %v90_v23, %v82_v12 }
  0x2c   :  { %v94_v28 = vld [vmem:[#allocation8 + $0x20] sm:$0xff]  ;;  %v99_v30 = vmul.f32 %v91_v24, %v83_v16  ;;  %v95_v31 = vld [vmem:[#allocation8 + $0x28] sm:$0xff]  ;;  %v96_v32 = vld [vmem:[#allocation8 + $0x30] sm:$0xff]  ;;  %v100_v34 = vmul.f32 %v92_v26, %v84_v17  ;;  %v101_v35 = vmul.f32 %v93_v27, %v85_v18 }
  0x2d   :  { %v97_v33 = vld [vmem:[#allocation8 + $0x38] sm:$0xff]  ;;  %v102_v36 = vmul.f32 %v94_v28, %v86_v20  ;;  %v103_v37 = vmul.f32 %v95_v31, %v87_v21  ;;  %v104_v38 = vmul.f32 %v96_v32, %v88_v22  ;;  %v125_v59 = vld [vmem:[%s329_s3] sm:$0x3]  ;;  %s237_s3 = scalar_lea.vmem %s161_s18, 32 }
  0x2e   :  { %v105_v39 = vmul.f32 %v97_v33, %v89_v25  ;;  %v106_v40 = vadd.f32 %v100_v34, %v98_v29  ;;  %v115_v41 = vadd.f32 %v101_v35, %v99_v30  ;;  %v127_v1 = vadd.f32 %v126_v60, %v125_v59  ;;  %v128_v3 = vld [vmem:[%s330_s4] sm:$0x3]  ;;  %p238_p1 = scmp.ne.s32.totalorder %s161_s18, %s237_s3  ;;  %p243_p3 = scmp.lt.s32.totalorder %s237_s3, %s237_s3 }
  0x30   :  { %v107_v42 = vadd.f32 %v106_v40, %v102_v36  ;;  %v116_v43 = vadd.f32 %v115_v41, %v103_v37  ;;  %v129_v5 = vadd.f32 %v128_v3, %v127_v1  ;;  %p244_p4 = por %p243_p3, %p242_p2 }
  0x32   :  { %v108_v44 = vadd.f32 %v107_v42, %v104_v38  ;;  %v117_v45 = vadd.f32 %v116_v43, %v105_v39  ;;  %p245_p5 = pnand %p244_p4, %p238_p1 }
  0x34   :  { %v109_v46 = vrot.slane %v108_v44, 4  ;;  %v118_v47 = vrot.slane %v117_v45, 4 }
  0x36   :  { %v110_v48 = vadd.f32 %v109_v46, %v108_v44  ;;  %v119_v49 = vadd.f32 %v118_v47, %v117_v45 }
  0x38   :  { %v111_v53 = vrot.slane %v110_v48, 2  ;;  %v120_v54 = vrot.slane %v119_v49, 2 }
  0x3a   :  { %v112_v55 = vadd.f32 %v111_v53, %v110_v48  ;;  %v121_v56 = vadd.f32 %v120_v54, %v119_v49 }
  0x3c   :  { %v113_v61 = vrot.slane %v112_v55, 1  ;;  %v122_v62 = vrot.slane %v121_v56, 1 }
  0x3e   :  { %v114_v63 = vadd.f32 %v113_v61, %v112_v55  ;;  %v123_v0 = vadd.f32 %v122_v62, %v121_v56 }
  0x40   :  { %v132_v4 = vcombine.low %v114_v63, %v123_v0 }
  0x42   :  { %v139_v6 = vrot.slane %v132_v4, %v138_v2 }
  0x44   :  { %v146_v7 = vrot.slane %v139_v6, %v138_v2 }
  0x46   :  { %v148_v8 = vadd.f32 %v146_v7, %v129_v5 }
  0x48   :  { %153 = vst.msk [vmem:[#allocation9] sm:$0x3] %vm151_vm0, %v148_v8 }
  0x49   :  { %248 = shalt.err (!%p245_p5)
}
  0x4a   :  { %163 = dma.vmem_to_hbm [thread:$0]  %s161_s18, 32, %s332_s6, [#allocation5]  }
  0x4b   :  { %261 = dma.done.wait [#allocation5], 32  }
  0x4c   :  { %262 = vsyncadd [#allocation5], 4294967264 }
  0x4d   :  { %167 = vsyncpa [#allocation4], 1 }
  0x4e   :  { %168 = vsyncpa [#allocation7], 1 }
  0x4f   :  { %169 = vsyncpa [#allocation5], 1 }

</bundles_post_ra>
